<compile_context>
chip_gen: v6e
topology: v6e:2x2x1
jax: 0.10.0
libtpu: 0.0.40
codegen_flags: <defaults>
</compile_context>

<pallas_src>
import functools
import math

import jax
import jax.numpy as jnp
from jax.experimental import pallas as pl
from jax.experimental.pallas import tpu as pltpu


# ----------------------------------------------------------------------------
# Kernel: fused clamp(min=0) + per-lane clamp(max = w-1 | h-1)
# ----------------------------------------------------------------------------
def _clip_boxes_kernel(b_ref, o_ref, *, wmax, hmax):
    dtype = o_ref.dtype
    lane_w = o_ref.shape[-1]
    # Tiny (1, lane_w) bound row; broadcasts over sublanes in jnp.minimum.
    # lane_w is a multiple of 4, so lane parity == coordinate parity:
    # even lane -> x coord (clamp to w-1), odd lane -> y coord (clamp to h-1).
    lane = jax.lax.broadcasted_iota(jnp.int32, (1, lane_w), 1)
    maxv = jnp.where((lane & 1) == 0,
                     jnp.asarray(wmax, dtype),
                     jnp.asarray(hmax, dtype))
    x = jnp.maximum(b_ref[...], jnp.asarray(0, dtype))
    o_ref[...] = jnp.minimum(x, maxv)


def clip_boxes(batch_imgs, batch_boxes):
    """batch_imgs: (N, C, H, W)  (only its static H, W are used)
       batch_boxes: (..., 4)  with [x1, y1, x2, y2] in the last dim."""
    assert batch_boxes.shape[-1] == 4, "boxes must have 4 coords in the last dim"
    h, w = batch_imgs.shape[-2], batch_imgs.shape[-1]

    orig_shape = batch_boxes.shape
    total = math.prod(orig_shape)

    # --- layout: lane_w multiple of 128, rows multiple of 8 (pad once if needed) ---
    lane_w = 128
    for cand in (4096, 2048, 1024, 512, 256, 128):
        if total >= 8 * cand:          # keep rows >= 8 (full sublane occupancy)
            lane_w = cand
            break
    rows = pl.cdiv(total, lane_w)
    rows = ((rows + 7) // 8) * 8       # multiple of 8 sublanes
    padded_total = rows * lane_w

    flat = batch_boxes.reshape(-1)
    if padded_total != total:
        flat = jnp.pad(flat, (0, padded_total - total))
    flat = flat.reshape(rows, lane_w)

    # --- row-tile sizing: ~2 MiB blocks; >=2 parallel blocks when rows allow ---
    bytes_per_elem = flat.dtype.itemsize
    target_rows = max(8, (2 * 1024 * 1024) // (lane_w * bytes_per_elem))
    target_rows = max(8, (target_rows // 8) * 8)
    tr = min(rows, target_rows)
    if rows >= 16 and tr >= rows:      # grid would be (1,): split for v7x megacore
        tr = ((rows // 2 + 7) // 8) * 8
    tr = max(8, min(tr, rows))
    grid = (pl.cdiv(rows, tr),)        # ragged tail masked by Pallas (elementwise-safe)

    out = pl.pallas_call(
        functools.partial(_clip_boxes_kernel, wmax=w - 1, hmax=h - 1),
        out_shape=jax.ShapeDtypeStruct((rows, lane_w), flat.dtype),
        grid=grid,
        in_specs=[pl.BlockSpec((tr, lane_w), lambda i: (i, 0))],
        out_specs=pl.BlockSpec((tr, lane_w), lambda i: (i, 0)),
        input_output_aliases={0: 0},
        compiler_params=pltpu.CompilerParams(
            dimension_semantics=("parallel",),
            vmem_limit_bytes=32 * 1024 * 1024,
        ),
    )(flat)

    out = out.reshape(-1)
    if padded_total != total:
        out = out[:total]
    return out.reshape(orig_shape)


# ----------------------------------------------------------------------------
# Pure-JAX reference (mirrors the PyTorch forward)
# ----------------------------------------------------------------------------
def clip_boxes_ref(batch_imgs, batch_boxes):
    h, w = batch_imgs.shape[-2], batch_imgs.shape[-1]
    b = jnp.maximum(batch_boxes, 0)
    maxs = jnp.asarray([w - 1, h - 1, w - 1, h - 1], b.dtype)
    return jnp.minimum(b, maxs)


def _check(batch_imgs, batch_boxes):
    fwd = jax.jit(clip_boxes)
    out = fwd(batch_imgs, batch_boxes)
    jax.block_until_ready(out)
    ref = clip_boxes_ref(batch_imgs, batch_boxes)
    assert out.shape == batch_boxes.shape
    assert jnp.allclose(out, ref), "Pallas output mismatch vs reference"
    assert float(out.min()) >= 0.0
    assert float(out[..., 0::2].max()) <= batch_imgs.shape[-1] - 1
    assert float(out[..., 1::2].max()) <= batch_imgs.shape[-2] - 1


if __name__ == "__main__":
    key = jax.random.PRNGKey(0)
    k_img, k_box1, k_box2, k_box3 = jax.random.split(key, 4)

    # Module-consistent shapes: images (N, C, H, W), boxes (N, M, 4).
    batch_imgs = jax.random.normal(k_img, (2, 3, 64, 80), jnp.float32)

    # Case 1: 2*128*4 = 1024 elements -> exact (8, 128) view, no padding.
    boxes1 = jax.random.uniform(k_box1, (2, 128, 4), jnp.float32,
                                minval=-30.0, maxval=120.0)
    _check(batch_imgs, boxes1)

    # Case 2: non-multiple-of-32 box count -> pad path + multi-block grid.
    boxes2 = jax.random.uniform(k_box2, (3, 1111, 4), jnp.float32,
                                minval=-30.0, maxval=120.0)
    _check(batch_imgs, boxes2)

    # Case 3: tiny box tensor -> heavy padding path.
    boxes3 = jax.random.uniform(k_box3, (2, 5, 4), jnp.float32,
                                minval=-30.0, maxval=120.0)
    _check(batch_imgs, boxes3)

    print("KERNEL_OK")
</pallas_src>

<mosaic_0001>
module attributes {stable_mosaic.version = 11 : i64} {
  func.func @_clip_boxes_kernel(%arg0: i32, %arg1: memref<8x128xf32, #tpu.memory_space<vmem>>, %arg2: memref<8x128xf32, #tpu.memory_space<vmem>>) attributes {dimension_semantics = [#tpu.dimension_semantics<parallel>], iteration_bounds = array<i64: 1>, scalar_prefetch = 0 : i64, scratch_operands = 0 : i64, tpu.core_type = #tpu.core_type<tc>, window_params = [{transform_indices = @transform_0, window_bounds = array<i64: 8, 128>}, {transform_indices = @transform_1, window_bounds = array<i64: 8, 128>}]} {
    %0 = tpu.iota {dimensions = array<i32: 1>} : vector<1x128xi32>
    %c1_i32 = arith.constant 1 : i32
    %1 = vector.broadcast %c1_i32 : i32 to vector<1x128xi32>
    %2 = arith.andi %0, %1 : vector<1x128xi32>
    %c0_i32 = arith.constant 0 : i32
    %3 = vector.broadcast %c0_i32 : i32 to vector<1x128xi32>
    %4 = arith.cmpi eq, %2, %3 : vector<1x128xi32>
    %cst = arith.constant 7.900000e+01 : f32
    %cst_0 = arith.constant 6.300000e+01 : f32
    %5 = vector.broadcast %cst : f32 to vector<1x128xf32>
    %6 = vector.broadcast %cst_0 : f32 to vector<1x128xf32>
    %7 = arith.select %4, %5, %6 : vector<1x128xi1>, vector<1x128xf32>
    %c0 = arith.constant 0 : index
    %c0_1 = arith.constant 0 : index
    %8 = vector.load %arg1[%c0, %c0_1] : memref<8x128xf32, #tpu.memory_space<vmem>>, vector<8x128xf32>
    %cst_2 = arith.constant 0.000000e+00 : f32
    %9 = vector.broadcast %cst_2 : f32 to vector<8x128xf32>
    %10 = arith.maximumf %8, %9 : vector<8x128xf32>
    %11 = vector.broadcast %7 : vector<1x128xf32> to vector<8x128xf32>
    %12 = arith.minimumf %10, %11 : vector<8x128xf32>
    %c0_3 = arith.constant 0 : index
    %c0_4 = arith.constant 0 : index
    %13 = vector.load %arg2[%c0_3, %c0_4] : memref<8x128xf32, #tpu.memory_space<vmem>>, vector<8x128xf32>
    tpu.vector_store %arg2[%c0_3, %c0_4], %12 {strides = array<i32>} : memref<8x128xf32, #tpu.memory_space<vmem>>, vector<8x128xf32>,
    return
  }
  func.func @transform_0(%arg0: i32) -> (i32, i32) {
    %c0_i32 = arith.constant 0 : i32
    %c0_i32_0 = arith.constant 0 : i32
    return %arg0, %c0_i32 : i32, i32
  }
  func.func @transform_1(%arg0: i32) -> (i32, i32) {
    %c0_i32 = arith.constant 0 : i32
    %c0_i32_0 = arith.constant 0 : i32
    return %arg0, %c0_i32 : i32, i32
  }
}

</mosaic_0001>

<bundles_post_ra>
// kernel: clip_boxes.1
= control target key start
LH: loop header
LB: loop body
LE: loop exit
PB: predicated region body
PF: predicated region fallthrough
CT: control target
= control target key end

     0   :  { %v8_v0 = vlaneseq  ;;  %v22_v5 = vmov 63.0   ;;  %s39_s0 = inlined_call_operand.vmem [shape: f32[8,128], index: 0, kind: input, shape index: {}, may-alias: {0,1}]   ;;  %s40_s1 = inlined_call_operand.vmem [shape: f32[8,128], index: 1, kind: output, shape index: {}, may-alias: {0,1}]  }
   0x1   :  { %v13_v1 = vld [vmem:[%s39_s0] sm:$0xff] }
   0x2   :  { %v9_v2 = vand.u32 127, %v8_v0  ;;  %v14_v4 = vmax.f32 %v13_v1, 0.0 }
   0x4   :  { %v10_v3 = vand.u32 1, %v9_v2 }
   0x6   :  { %vm11_vm0 = vcmp.eq.s32.totalorder %v10_v3, 0 }
   0x7   :  { %v12_v6 = vsel %vm11_vm0, 79.0, %v22_v5 }
   0x8   :  { %v15_v7 = vmin.f32 %v14_v4, %v12_v6 }
   0xa   :  { %16 = vst [vmem:[%s40_s1] sm:$0xff] %v15_v7 }

</bundles_post_ra>
